<compile_context>
chip_gen: v7x
topology: tpu7x:2x2x1
jax: 0.10.0
libtpu: 0.0.40
codegen_flags: <defaults>
</compile_context>

<pallas_src>
import math

import jax
import jax.numpy as jnp
import numpy as np
from jax.experimental import pallas as pl
from jax.experimental.pallas import tpu as pltpu

HIDDEN = 128      # hidden_size (module default)
SEQ_LEN = 8       # prefix length used for the example


# ---------------------------------------------------------------------------
# Pallas kernel: fused gate matrix -> unrolled GRU -> heads -> decode
# ---------------------------------------------------------------------------
def log_coeff_rnn_kernel(enc_ref, w_fused_ref, b_gates_ref, w_hh_ref,
                         head_ref, out_ref):
    L = enc_ref.shape[0]
    H = w_hh_ref.shape[0]

    enc = enc_ref[...]                         # (L, 2)  [log|c|, sign(c)]
    wf = w_fused_ref[...]                      # (2, 3H) fused input->gate weight
    b_gx = b_gates_ref[0:1, :]                 # (1, 3H) fused gate bias
    b_hn = b_gates_ref[1:2, 0:H]               # (1, H)  hidden-side n-gate bias

    # Input-side gate pre-activations for every step at once: (L, 3H).
    # Two broadcast multiplies on the VPU -- no MXU pass, no padded input.
    gx = enc[:, 0:1] * wf[0:1, :] + enc[:, 1:2] * wf[1:2, :] + b_gx

    # Recurrent weight: stored bf16 for DMA, math in f32 (convert once).
    w_hh = w_hh_ref[...].astype(jnp.float32)   # (H, 3H)

    # ---- step 0: h == 0, so the hidden-side matmul contributes nothing ----
    gx0 = gx[0:1, :]
    r0 = jax.nn.sigmoid(gx0[:, 0:H])
    z0 = jax.nn.sigmoid(gx0[:, H:2 * H])
    n0 = jnp.tanh(gx0[:, 2 * H:3 * H] + r0 * b_hn)
    h = (1.0 - z0) * n0                        # (1, H)

    # ---- steps 1..L-1: fully unrolled, static slices of gx ----
    for t in range(1, L):
        gxt = gx[t:t + 1, :]                   # (1, 3H) static sublane slice
        gh = jnp.dot(h, w_hh, preferred_element_type=jnp.float32)  # (1, 3H)
        r = jax.nn.sigmoid(gxt[:, 0:H] + gh[:, 0:H])
        z = jax.nn.sigmoid(gxt[:, H:2 * H] + gh[:, H:2 * H])
        n = jnp.tanh(gxt[:, 2 * H:3 * H] + r * (gh[:, 2 * H:3 * H] + b_hn))
        h = (1.0 - z) * n + z * h

    # ---- heads: VPU multiply + lane reduce (no padded MXU pass) ----
    log_mag = jnp.sum(h * head_ref[0:1, :], axis=-1, keepdims=True) \
        + head_ref[2:3, 0:1]                                        # (1, 1)
    sgn_raw = jnp.sum(h * head_ref[1:2, :], axis=-1, keepdims=True) \
        + head_ref[2:3, 1:2]                                        # (1, 1)
    sgn = jnp.tanh(sgn_raw)
    mag = jnp.where(log_mag < -20.0, 0.0, jnp.exp(log_mag))
    out_ref[...] = sgn * mag


# ---------------------------------------------------------------------------
# Parameter init (deterministic, mirrors the PyTorch _init_weights)
# ---------------------------------------------------------------------------
def init_params(key, hidden, init_scale=0.1):
    def xavier(key, shape, fan_in, fan_out):
        bound = init_scale * math.sqrt(6.0 / (fan_in + fan_out))
        return jax.random.uniform(key, shape, jnp.float32, -bound, bound)

    k1, k2, k3, k4, k5 = jax.random.split(key, 5)
    # nn.Linear(2, H).weight has shape (H, 2); store transposed (2, H).
    w_in = xavier(k1, (2, hidden), fan_in=2, fan_out=hidden)
    # GRU weight_ih_l0 (3H, H) and weight_hh_l0 (3H, H); store transposed.
    w_ih_t = xavier(k2, (hidden, 3 * hidden), fan_in=hidden, fan_out=3 * hidden)
    w_hh_t = xavier(k3, (hidden, 3 * hidden), fan_in=hidden, fan_out=3 * hidden)
    # Heads: nn.Linear(H, 1).weight shape (1, H); store transposed (H, 1).
    w_logmag = xavier(k4, (hidden, 1), fan_in=hidden, fan_out=1)
    w_sign = xavier(k5, (hidden, 1), fan_in=hidden, fan_out=1)
    return dict(
        w_in=w_in,
        b_in=jnp.zeros((1, hidden), jnp.float32),
        w_ih_t=w_ih_t,
        w_hh_t=w_hh_t,
        b_ih=jnp.zeros((1, 3 * hidden), jnp.float32),
        b_hh=jnp.zeros((1, 3 * hidden), jnp.float32),
        w_logmag=w_logmag,
        w_sign=w_sign,
        b_logmag=jnp.zeros((1,), jnp.float32),
        b_sign=jnp.zeros((1,), jnp.float32),
    )


def pack_params(params):
    """Once-per-parameter-set packing/fusion for the kernel (all in f32)."""
    H = params["w_in"].shape[1]

    # Fuse input projection into the input->gate matrix: (2, 3H).
    w_fused = (params["w_in"] @ params["w_ih_t"]).astype(jnp.float32)

    # Fused gate bias: b_in @ W_ih + b_ih, plus the r/z thirds of b_hh
    # (they appear purely additively). The n-gate hidden bias must stay
    # separate because it is scaled by r inside the GRU cell.
    b_fused = params["b_in"] @ params["w_ih_t"] + params["b_ih"]     # (1, 3H)
    b_fused = b_fused.at[:, :2 * H].add(params["b_hh"][:, :2 * H])
    b_gates = jnp.zeros((2, 3 * H), jnp.float32)
    b_gates = b_gates.at[0:1, :].set(b_fused)
    b_gates = b_gates.at[1, :H].set(params["b_hh"][0, 2 * H:])       # b_hn

    # Heads packed into one (3, H) array: rows 0/1 = weights, row 2 = biases
    # in lanes 0 (log-magnitude) and 1 (sign).
    head = jnp.zeros((3, H), jnp.float32)
    head = head.at[0, :].set(params["w_logmag"][:, 0])
    head = head.at[1, :].set(params["w_sign"][:, 0])
    head = head.at[2, 0].set(params["b_logmag"][0])
    head = head.at[2, 1].set(params["b_sign"][0])

    # Big recurrent weight stored in bf16 (halves the dominant DMA bytes).
    w_hh_bf16 = params["w_hh_t"].astype(jnp.bfloat16)

    return dict(w_fused=w_fused, b_gates=b_gates, w_hh=w_hh_bf16, head=head)


def encode_prefix(prefix):
    """encode_coefficient applied per element -> (L, 2) = [log|c|, sign]."""
    abs_c = jnp.abs(prefix)
    is_zero = abs_c < 1e-15
    log_mag = jnp.where(is_zero, jnp.float32(-30.0), jnp.log(abs_c + 1e-15))
    sign = jnp.where(is_zero, jnp.float32(1.0), jnp.sign(prefix))
    return jnp.stack([log_mag, sign], axis=-1).astype(jnp.float32)


# ---------------------------------------------------------------------------
# Wrapper around pallas_call
# ---------------------------------------------------------------------------
def log_coeff_rnn_forward(prefix, packed):
    L = prefix.shape[0]

    if L == 0:
        # Empty-prefix branch of the PyTorch forward: hidden state stays zero,
        # so the heads act on zeros and only the head biases matter.
        log_mag = packed["head"][2, 0]
        sgn = jnp.tanh(packed["head"][2, 1])
        mag = jnp.where(log_mag < -20.0, 0.0, jnp.exp(log_mag))
        return sgn * mag

    enc = encode_prefix(prefix)                                   # (L, 2)

    vmem = pltpu.MemorySpace.VMEM
    out = pl.pallas_call(
        log_coeff_rnn_kernel,
        out_shape=jax.ShapeDtypeStruct((1, 1), jnp.float32),
        in_specs=[pl.BlockSpec(memory_space=vmem)] * 5,
        out_specs=pl.BlockSpec(memory_space=vmem),
    )(enc, packed["w_fused"], packed["b_gates"], packed["w_hh"], packed["head"])
    return out[0, 0]


# ---------------------------------------------------------------------------
# Pure-JAX reference (un-fused formulation) for a correctness check
# ---------------------------------------------------------------------------
def reference_forward(prefix, params):
    H = params["w_in"].shape[1]
    # The kernel stores the recurrent weight in bfloat16 (DMA optimization);
    # quantize identically here so the check isolates kernel correctness.
    w_hh = params["w_hh_t"].astype(jnp.bfloat16).astype(jnp.float32)

    enc = encode_prefix(prefix)                                   # (L, 2)
    xp = enc @ params["w_in"] + params["b_in"]                    # (L, H)
    gx = xp @ params["w_ih_t"] + params["b_ih"]                   # (L, 3H)
    h = jnp.zeros((1, H), jnp.float32)
    for t in range(prefix.shape[0]):
        gxt = gx[t:t + 1]
        gh = h @ w_hh + params["b_hh"]
        r = jax.nn.sigmoid(gxt[:, :H] + gh[:, :H])
        z = jax.nn.sigmoid(gxt[:, H:2 * H] + gh[:, H:2 * H])
        n = jnp.tanh(gxt[:, 2 * H:] + r * gh[:, 2 * H:])
        h = (1.0 - z) * n + z * h
    log_mag = (h @ params["w_logmag"])[0, 0] + params["b_logmag"][0]
    sgn_raw = (h @ params["w_sign"])[0, 0] + params["b_sign"][0]
    sgn = jnp.tanh(sgn_raw)
    mag = jnp.where(log_mag < -20.0, 0.0, jnp.exp(log_mag))
    return sgn * mag


if __name__ == "__main__":
    key = jax.random.PRNGKey(0)
    k_prefix, k_params = jax.random.split(key)

    prefix = jax.random.normal(k_prefix, (SEQ_LEN,), jnp.float32)  # 1-D prefix
    params = init_params(k_params, HIDDEN, init_scale=0.1)
    packed = pack_params(params)          # once per parameter set

    coeff = log_coeff_rnn_forward(prefix, packed)
    coeff = jax.block_until_ready(coeff)

    ref = jax.block_until_ready(reference_forward(prefix, params))
    np.testing.assert_allclose(np.asarray(coeff), np.asarray(ref),
                               rtol=2e-3, atol=2e-3)

    print("KERNEL_OK")
</pallas_src>

<mosaic_0001>
module attributes {stable_mosaic.version = 11 : i64} {
  func.func @log_coeff_rnn_kernel(%arg0: memref<8x2xf32, #tpu.memory_space<vmem>>, %arg1: memref<2x384xf32, #tpu.memory_space<vmem>>, %arg2: memref<2x384xf32, #tpu.memory_space<vmem>>, %arg3: memref<128x384xbf16, #tpu.memory_space<vmem>>, %arg4: memref<3x128xf32, #tpu.memory_space<vmem>>, %arg5: memref<1x1xf32, #tpu.memory_space<vmem>>) attributes {dimension_semantics = [], scalar_prefetch = 0 : i64, scratch_operands = 0 : i64, tpu.core_type = #tpu.core_type<tc>} {
    %c0 = arith.constant 0 : index
    %c0_0 = arith.constant 0 : index
    %0 = vector.load %arg0[%c0, %c0_0] : memref<8x2xf32, #tpu.memory_space<vmem>>, vector<8x2xf32>
    %c0_1 = arith.constant 0 : index
    %c0_2 = arith.constant 0 : index
    %1 = vector.load %arg1[%c0_1, %c0_2] : memref<2x384xf32, #tpu.memory_space<vmem>>, vector<2x384xf32>
    %c0_3 = arith.constant 0 : index
    %c0_4 = arith.constant 0 : index
    %2 = vector.load %arg2[%c0_3, %c0_4] : memref<2x384xf32, #tpu.memory_space<vmem>>, vector<1x384xf32>
    %c1 = arith.constant 1 : index
    %c0_5 = arith.constant 0 : index
    %3 = vector.load %arg2[%c1, %c0_5] : memref<2x384xf32, #tpu.memory_space<vmem>>, vector<1x128xf32>
    %4 = vector.extract_strided_slice %0 {offsets = [0, 0], sizes = [8, 1], strides = [1, 1]} : vector<8x2xf32> to vector<8x1xf32>
    %5 = vector.extract_strided_slice %1 {offsets = [0, 0], sizes = [1, 384], strides = [1, 1]} : vector<2x384xf32> to vector<1x384xf32>
    %6 = vector.broadcast %4 : vector<8x1xf32> to vector<8x384xf32>
    %7 = vector.broadcast %5 : vector<1x384xf32> to vector<8x384xf32>
    %8 = arith.mulf %6, %7 : vector<8x384xf32>
    %9 = vector.extract_strided_slice %0 {offsets = [0, 1], sizes = [8, 1], strides = [1, 1]} : vector<8x2xf32> to vector<8x1xf32>
    %10 = vector.extract_strided_slice %1 {offsets = [1, 0], sizes = [1, 384], strides = [1, 1]} : vector<2x384xf32> to vector<1x384xf32>
    %11 = vector.broadcast %9 : vector<8x1xf32> to vector<8x384xf32>
    %12 = vector.broadcast %10 : vector<1x384xf32> to vector<8x384xf32>
    %13 = arith.mulf %11, %12 : vector<8x384xf32>
    %14 = arith.addf %8, %13 : vector<8x384xf32>
    %15 = vector.broadcast %2 : vector<1x384xf32> to vector<8x384xf32>
    %16 = arith.addf %14, %15 : vector<8x384xf32>
    %c0_6 = arith.constant 0 : index
    %c0_7 = arith.constant 0 : index
    %17 = vector.load %arg3[%c0_6, %c0_7] : memref<128x384xbf16, #tpu.memory_space<vmem>>, vector<128x384xbf16>
    %18 = arith.extf %17 : vector<128x384xbf16> to vector<128x384xf32>
    %19 = vector.extract_strided_slice %16 {offsets = [0, 0], sizes = [1, 384], strides = [1, 1]} : vector<8x384xf32> to vector<1x384xf32>
    %20 = vector.extract_strided_slice %19 {offsets = [0, 0], sizes = [1, 128], strides = [1, 1]} : vector<1x384xf32> to vector<1x128xf32>
    %21 = arith.negf %20 : vector<1x128xf32>
    %22 = math.exp %21 : vector<1x128xf32>
    %cst = arith.constant 1.000000e+00 : f32
    %23 = vector.broadcast %cst : f32 to vector<1x128xf32>
    %24 = arith.addf %23, %22 : vector<1x128xf32>
    %25 = arith.divf %23, %24 : vector<1x128xf32>
    %26 = vector.extract_strided_slice %19 {offsets = [0, 128], sizes = [1, 128], strides = [1, 1]} : vector<1x384xf32> to vector<1x128xf32>
    %27 = arith.negf %26 : vector<1x128xf32>
    %28 = math.exp %27 : vector<1x128xf32>
    %cst_8 = arith.constant 1.000000e+00 : f32
    %29 = vector.broadcast %cst_8 : f32 to vector<1x128xf32>
    %30 = arith.addf %29, %28 : vector<1x128xf32>
    %31 = arith.divf %29, %30 : vector<1x128xf32>
    %32 = vector.extract_strided_slice %19 {offsets = [0, 256], sizes = [1, 128], strides = [1, 1]} : vector<1x384xf32> to vector<1x128xf32>
    %33 = arith.mulf %25, %3 : vector<1x128xf32>
    %34 = arith.addf %32, %33 : vector<1x128xf32>
    %35 = math.tanh %34 : vector<1x128xf32>
    %cst_9 = arith.constant 1.000000e+00 : f32
    %36 = vector.broadcast %cst_9 : f32 to vector<1x128xf32>
    %37 = arith.subf %36, %31 : vector<1x128xf32>
    %38 = arith.mulf %37, %35 : vector<1x128xf32>
    %39 = vector.extract_strided_slice %16 {offsets = [1, 0], sizes = [1, 384], strides = [1, 1]} : vector<8x384xf32> to vector<1x384xf32>
    %cst_10 = arith.constant dense<0.000000e+00> : vector<1x384xf32>
    %40 = tpu.matmul %38, %18, %cst_10 {dimension_numbers = #tpu.dot_dimension_numbers<[1], [0], [0], [1], [0, 0, 1, 1], [], []>} : vector<1x128xf32>, vector<128x384xf32>, vector<1x384xf32> -> vector<1x384xf32>
    %41 = vector.extract_strided_slice %39 {offsets = [0, 0], sizes = [1, 128], strides = [1, 1]} : vector<1x384xf32> to vector<1x128xf32>
    %42 = vector.extract_strided_slice %40 {offsets = [0, 0], sizes = [1, 128], strides = [1, 1]} : vector<1x384xf32> to vector<1x128xf32>
    %43 = arith.addf %41, %42 : vector<1x128xf32>
    %44 = arith.negf %43 : vector<1x128xf32>
    %45 = math.exp %44 : vector<1x128xf32>
    %cst_11 = arith.constant 1.000000e+00 : f32
    %46 = vector.broadcast %cst_11 : f32 to vector<1x128xf32>
    %47 = arith.addf %46, %45 : vector<1x128xf32>
    %48 = arith.divf %46, %47 : vector<1x128xf32>
    %49 = vector.extract_strided_slice %39 {offsets = [0, 128], sizes = [1, 128], strides = [1, 1]} : vector<1x384xf32> to vector<1x128xf32>
    %50 = vector.extract_strided_slice %40 {offsets = [0, 128], sizes = [1, 128], strides = [1, 1]} : vector<1x384xf32> to vector<1x128xf32>
    %51 = arith.addf %49, %50 : vector<1x128xf32>
    %52 = arith.negf %51 : vector<1x128xf32>
    %53 = math.exp %52 : vector<1x128xf32>
    %cst_12 = arith.constant 1.000000e+00 : f32
    %54 = vector.broadcast %cst_12 : f32 to vector<1x128xf32>
    %55 = arith.addf %54, %53 : vector<1x128xf32>
    %56 = arith.divf %54, %55 : vector<1x128xf32>
    %57 = vector.extract_strided_slice %39 {offsets = [0, 256], sizes = [1, 128], strides = [1, 1]} : vector<1x384xf32> to vector<1x128xf32>
    %58 = vector.extract_strided_slice %40 {offsets = [0, 256], sizes = [1, 128], strides = [1, 1]} : vector<1x384xf32> to vector<1x128xf32>
    %59 = arith.addf %58, %3 : vector<1x128xf32>
    %60 = arith.mulf %48, %59 : vector<1x128xf32>
    %61 = arith.addf %57, %60 : vector<1x128xf32>
    %62 = math.tanh %61 : vector<1x128xf32>
    %cst_13 = arith.constant 1.000000e+00 : f32
    %63 = vector.broadcast %cst_13 : f32 to vector<1x128xf32>
    %64 = arith.subf %63, %56 : vector<1x128xf32>
    %65 = arith.mulf %64, %62 : vector<1x128xf32>
    %66 = arith.mulf %56, %38 : vector<1x128xf32>
    %67 = arith.addf %65, %66 : vector<1x128xf32>
    %68 = vector.extract_strided_slice %16 {offsets = [2, 0], sizes = [1, 384], strides = [1, 1]} : vector<8x384xf32> to vector<1x384xf32>
    %cst_14 = arith.constant dense<0.000000e+00> : vector<1x384xf32>
    %69 = tpu.matmul %67, %18, %cst_14 {dimension_numbers = #tpu.dot_dimension_numbers<[1], [0], [0], [1], [0, 0, 1, 1], [], []>} : vector<1x128xf32>, vector<128x384xf32>, vector<1x384xf32> -> vector<1x384xf32>
    %70 = vector.extract_strided_slice %68 {offsets = [0, 0], sizes = [1, 128], strides = [1, 1]} : vector<1x384xf32> to vector<1x128xf32>
    %71 = vector.extract_strided_slice %69 {offsets = [0, 0], sizes = [1, 128], strides = [1, 1]} : vector<1x384xf32> to vector<1x128xf32>
    %72 = arith.addf %70, %71 : vector<1x128xf32>
    %73 = arith.negf %72 : vector<1x128xf32>
    %74 = math.exp %73 : vector<1x128xf32>
    %cst_15 = arith.constant 1.000000e+00 : f32
    %75 = vector.broadcast %cst_15 : f32 to vector<1x128xf32>
    %76 = arith.addf %75, %74 : vector<1x128xf32>
    %77 = arith.divf %75, %76 : vector<1x128xf32>
    %78 = vector.extract_strided_slice %68 {offsets = [0, 128], sizes = [1, 128], strides = [1, 1]} : vector<1x384xf32> to vector<1x128xf32>
    %79 = vector.extract_strided_slice %69 {offsets = [0, 128], sizes = [1, 128], strides = [1, 1]} : vector<1x384xf32> to vector<1x128xf32>
    %80 = arith.addf %78, %79 : vector<1x128xf32>
    %81 = arith.negf %80 : vector<1x128xf32>
    %82 = math.exp %81 : vector<1x128xf32>
    %cst_16 = arith.constant 1.000000e+00 : f32
    %83 = vector.broadcast %cst_16 : f32 to vector<1x128xf32>
    %84 = arith.addf %83, %82 : vector<1x128xf32>
    %85 = arith.divf %83, %84 : vector<1x128xf32>
    %86 = vector.extract_strided_slice %68 {offsets = [0, 256], sizes = [1, 128], strides = [1, 1]} : vector<1x384xf32> to vector<1x128xf32>
    %87 = vector.extract_strided_slice %69 {offsets = [0, 256], sizes = [1, 128], strides = [1, 1]} : vector<1x384xf32> to vector<1x128xf32>
    %88 = arith.addf %87, %3 : vector<1x128xf32>
    %89 = arith.mulf %77, %88 : vector<1x128xf32>
    %90 = arith.addf %86, %89 : vector<1x128xf32>
    %91 = math.tanh %90 : vector<1x128xf32>
    %cst_17 = arith.constant 1.000000e+00 : f32
    %92 = vector.broadcast %cst_17 : f32 to vector<1x128xf32>
    %93 = arith.subf %92, %85 : vector<1x128xf32>
    %94 = arith.mulf %93, %91 : vector<1x128xf32>
    %95 = arith.mulf %85, %67 : vector<1x128xf32>
    %96 = arith.addf %94, %95 : vector<1x128xf32>
    %97 = vector.extract_strided_slice %16 {offsets = [3, 0], sizes = [1, 384], strides = [1, 1]} : vector<8x384xf32> to vector<1x384xf32>
    %cst_18 = arith.constant dense<0.000000e+00> : vector<1x384xf32>
    %98 = tpu.matmul %96, %18, %cst_18 {dimension_numbers = #tpu.dot_dimension_numbers<[1], [0], [0], [1], [0, 0, 1, 1], [], []>} : vector<1x128xf32>, vector<128x384xf32>, vector<1x384xf32> -> vector<1x384xf32>
    %99 = vector.extract_strided_slice %97 {offsets = [0, 0], sizes = [1, 128], strides = [1, 1]} : vector<1x384xf32> to vector<1x128xf32>
    %100 = vector.extract_strided_slice %98 {offsets = [0, 0], sizes = [1, 128], strides = [1, 1]} : vector<1x384xf32> to vector<1x128xf32>
    %101 = arith.addf %99, %100 : vector<1x128xf32>
    %102 = arith.negf %101 : vector<1x128xf32>
    %103 = math.exp %102 : vector<1x128xf32>
    %cst_19 = arith.constant 1.000000e+00 : f32
    %104 = vector.broadcast %cst_19 : f32 to vector<1x128xf32>
    %105 = arith.addf %104, %103 : vector<1x128xf32>
    %106 = arith.divf %104, %105 : vector<1x128xf32>
    %107 = vector.extract_strided_slice %97 {offsets = [0, 128], sizes = [1, 128], strides = [1, 1]} : vector<1x384xf32> to vector<1x128xf32>
    %108 = vector.extract_strided_slice %98 {offsets = [0, 128], sizes = [1, 128], strides = [1, 1]} : vector<1x384xf32> to vector<1x128xf32>
    %109 = arith.addf %107, %108 : vector<1x128xf32>
    %110 = arith.negf %109 : vector<1x128xf32>
    %111 = math.exp %110 : vector<1x128xf32>
    %cst_20 = arith.constant 1.000000e+00 : f32
    %112 = vector.broadcast %cst_20 : f32 to vector<1x128xf32>
    %113 = arith.addf %112, %111 : vector<1x128xf32>
    %114 = arith.divf %112, %113 : vector<1x128xf32>
    %115 = vector.extract_strided_slice %97 {offsets = [0, 256], sizes = [1, 128], strides = [1, 1]} : vector<1x384xf32> to vector<1x128xf32>
    %116 = vector.extract_strided_slice %98 {offsets = [0, 256], sizes = [1, 128], strides = [1, 1]} : vector<1x384xf32> to vector<1x128xf32>
    %117 = arith.addf %116, %3 : vector<1x128xf32>
    %118 = arith.mulf %106, %117 : vector<1x128xf32>
    %119 = arith.addf %115, %118 : vector<1x128xf32>
    %120 = math.tanh %119 : vector<1x128xf32>
    %cst_21 = arith.constant 1.000000e+00 : f32
    %121 = vector.broadcast %cst_21 : f32 to vector<1x128xf32>
    %122 = arith.subf %121, %114 : vector<1x128xf32>
    %123 = arith.mulf %122, %120 : vector<1x128xf32>
    %124 = arith.mulf %114, %96 : vector<1x128xf32>
    %125 = arith.addf %123, %124 : vector<1x128xf32>
    %126 = vector.extract_strided_slice %16 {offsets = [4, 0], sizes = [1, 384], strides = [1, 1]} : vector<8x384xf32> to vector<1x384xf32>
    %cst_22 = arith.constant dense<0.000000e+00> : vector<1x384xf32>
    %127 = tpu.matmul %125, %18, %cst_22 {dimension_numbers = #tpu.dot_dimension_numbers<[1], [0], [0], [1], [0, 0, 1, 1], [], []>} : vector<1x128xf32>, vector<128x384xf32>, vector<1x384xf32> -> vector<1x384xf32>
    %128 = vector.extract_strided_slice %126 {offsets = [0, 0], sizes = [1, 128], strides = [1, 1]} : vector<1x384xf32> to vector<1x128xf32>
    %129 = vector.extract_strided_slice %127 {offsets = [0, 0], sizes = [1, 128], strides = [1, 1]} : vector<1x384xf32> to vector<1x128xf32>
    %130 = arith.addf %128, %129 : vector<1x128xf32>
    %131 = arith.negf %130 : vector<1x128xf32>
    %132 = math.exp %131 : vector<1x128xf32>
    %cst_23 = arith.constant 1.000000e+00 : f32
    %133 = vector.broadcast %cst_23 : f32 to vector<1x128xf32>
    %134 = arith.addf %133, %132 : vector<1x128xf32>
    %135 = arith.divf %133, %134 : vector<1x128xf32>
    %136 = vector.extract_strided_slice %126 {offsets = [0, 128], sizes = [1, 128], strides = [1, 1]} : vector<1x384xf32> to vector<1x128xf32>
    %137 = vector.extract_strided_slice %127 {offsets = [0, 128], sizes = [1, 128], strides = [1, 1]} : vector<1x384xf32> to vector<1x128xf32>
    %138 = arith.addf %136, %137 : vector<1x128xf32>
    %139 = arith.negf %138 : vector<1x128xf32>
    %140 = math.exp %139 : vector<1x128xf32>
    %cst_24 = arith.constant 1.000000e+00 : f32
    %141 = vector.broadcast %cst_24 : f32 to vector<1x128xf32>
    %142 = arith.addf %141, %140 : vector<1x128xf32>
    %143 = arith.divf %141, %142 : vector<1x128xf32>
    %144 = vector.extract_strided_slice %126 {offsets = [0, 256], sizes = [1, 128], strides = [1, 1]} : vector<1x384xf32> to vector<1x128xf32>
    %145 = vector.extract_strided_slice %127 {offsets = [0, 256], sizes = [1, 128], strides = [1, 1]} : vector<1x384xf32> to vector<1x128xf32>
    %146 = arith.addf %145, %3 : vector<1x128xf32>
    %147 = arith.mulf %135, %146 : vector<1x128xf32>
    %148 = arith.addf %144, %147 : vector<1x128xf32>
    %149 = math.tanh %148 : vector<1x128xf32>
    %cst_25 = arith.constant 1.000000e+00 : f32
    %150 = vector.broadcast %cst_25 : f32 to vector<1x128xf32>
    %151 = arith.subf %150, %143 : vector<1x128xf32>
    %152 = arith.mulf %151, %149 : vector<1x128xf32>
    %153 = arith.mulf %143, %125 : vector<1x128xf32>
    %154 = arith.addf %152, %153 : vector<1x128xf32>
    %155 = vector.extract_strided_slice %16 {offsets = [5, 0], sizes = [1, 384], strides = [1, 1]} : vector<8x384xf32> to vector<1x384xf32>
    %cst_26 = arith.constant dense<0.000000e+00> : vector<1x384xf32>
    %156 = tpu.matmul %154, %18, %cst_26 {dimension_numbers = #tpu.dot_dimension_numbers<[1], [0], [0], [1], [0, 0, 1, 1], [], []>} : vector<1x128xf32>, vector<128x384xf32>, vector<1x384xf32> -> vector<1x384xf32>
    %157 = vector.extract_strided_slice %155 {offsets = [0, 0], sizes = [1, 128], strides = [1, 1]} : vector<1x384xf32> to vector<1x128xf32>
    %158 = vector.extract_strided_slice %156 {offsets = [0, 0], sizes = [1, 128], strides = [1, 1]} : vector<1x384xf32> to vector<1x128xf32>
    %159 = arith.addf %157, %158 : vector<1x128xf32>
    %160 = arith.negf %159 : vector<1x128xf32>
    %161 = math.exp %160 : vector<1x128xf32>
    %cst_27 = arith.constant 1.000000e+00 : f32
    %162 = vector.broadcast %cst_27 : f32 to vector<1x128xf32>
    %163 = arith.addf %162, %161 : vector<1x128xf32>
    %164 = arith.divf %162, %163 : vector<1x128xf32>
    %165 = vector.extract_strided_slice %155 {offsets = [0, 128], sizes = [1, 128], strides = [1, 1]} : vector<1x384xf32> to vector<1x128xf32>
    %166 = vector.extract_strided_slice %156 {offsets = [0, 128], sizes = [1, 128], strides = [1, 1]} : vector<1x384xf32> to vector<1x128xf32>
    %167 = arith.addf %165, %166 : vector<1x128xf32>
    %168 = arith.negf %167 : vector<1x128xf32>
    %169 = math.exp %168 : vector<1x128xf32>
    %cst_28 = arith.constant 1.000000e+00 : f32
    %170 = vector.broadcast %cst_28 : f32 to vector<1x128xf32>
    %171 = arith.addf %170, %169 : vector<1x128xf32>
    %172 = arith.divf %170, %171 : vector<1x128xf32>
    %173 = vector.extract_strided_slice %155 {offsets = [0, 256], sizes = [1, 128], strides = [1, 1]} : vector<1x384xf32> to vector<1x128xf32>
    %174 = vector.extract_strided_slice %156 {offsets = [0, 256], sizes = [1, 128], strides = [1, 1]} : vector<1x384xf32> to vector<1x128xf32>
    %175 = arith.addf %174, %3 : vector<1x128xf32>
    %176 = arith.mulf %164, %175 : vector<1x128xf32>
    %177 = arith.addf %173, %176 : vector<1x128xf32>
    %178 = math.tanh %177 : vector<1x128xf32>
    %cst_29 = arith.constant 1.000000e+00 : f32
    %179 = vector.broadcast %cst_29 : f32 to vector<1x128xf32>
    %180 = arith.subf %179, %172 : vector<1x128xf32>
    %181 = arith.mulf %180, %178 : vector<1x128xf32>
    %182 = arith.mulf %172, %154 : vector<1x128xf32>
    %183 = arith.addf %181, %182 : vector<1x128xf32>
    %184 = vector.extract_strided_slice %16 {offsets = [6, 0], sizes = [1, 384], strides = [1, 1]} : vector<8x384xf32> to vector<1x384xf32>
    %cst_30 = arith.constant dense<0.000000e+00> : vector<1x384xf32>
    %185 = tpu.matmul %183, %18, %cst_30 {dimension_numbers = #tpu.dot_dimension_numbers<[1], [0], [0], [1], [0, 0, 1, 1], [], []>} : vector<1x128xf32>, vector<128x384xf32>, vector<1x384xf32> -> vector<1x384xf32>
    %186 = vector.extract_strided_slice %184 {offsets = [0, 0], sizes = [1, 128], strides = [1, 1]} : vector<1x384xf32> to vector<1x128xf32>
    %187 = vector.extract_strided_slice %185 {offsets = [0, 0], sizes = [1, 128], strides = [1, 1]} : vector<1x384xf32> to vector<1x128xf32>
    %188 = arith.addf %186, %187 : vector<1x128xf32>
    %189 = arith.negf %188 : vector<1x128xf32>
    %190 = math.exp %189 : vector<1x128xf32>
    %cst_31 = arith.constant 1.000000e+00 : f32
    %191 = vector.broadcast %cst_31 : f32 to vector<1x128xf32>
    %192 = arith.addf %191, %190 : vector<1x128xf32>
    %193 = arith.divf %191, %192 : vector<1x128xf32>
    %194 = vector.extract_strided_slice %184 {offsets = [0, 128], sizes = [1, 128], strides = [1, 1]} : vector<1x384xf32> to vector<1x128xf32>
    %195 = vector.extract_strided_slice %185 {offsets = [0, 128], sizes = [1, 128], strides = [1, 1]} : vector<1x384xf32> to vector<1x128xf32>
    %196 = arith.addf %194, %195 : vector<1x128xf32>
    %197 = arith.negf %196 : vector<1x128xf32>
    %198 = math.exp %197 : vector<1x128xf32>
    %cst_32 = arith.constant 1.000000e+00 : f32
    %199 = vector.broadcast %cst_32 : f32 to vector<1x128xf32>
    %200 = arith.addf %199, %198 : vector<1x128xf32>
    %201 = arith.divf %199, %200 : vector<1x128xf32>
    %202 = vector.extract_strided_slice %184 {offsets = [0, 256], sizes = [1, 128], strides = [1, 1]} : vector<1x384xf32> to vector<1x128xf32>
    %203 = vector.extract_strided_slice %185 {offsets = [0, 256], sizes = [1, 128], strides = [1, 1]} : vector<1x384xf32> to vector<1x128xf32>
    %204 = arith.addf %203, %3 : vector<1x128xf32>
    %205 = arith.mulf %193, %204 : vector<1x128xf32>
    %206 = arith.addf %202, %205 : vector<1x128xf32>
    %207 = math.tanh %206 : vector<1x128xf32>
    %cst_33 = arith.constant 1.000000e+00 : f32
    %208 = vector.broadcast %cst_33 : f32 to vector<1x128xf32>
    %209 = arith.subf %208, %201 : vector<1x128xf32>
    %210 = arith.mulf %209, %207 : vector<1x128xf32>
    %211 = arith.mulf %201, %183 : vector<1x128xf32>
    %212 = arith.addf %210, %211 : vector<1x128xf32>
    %213 = vector.extract_strided_slice %16 {offsets = [7, 0], sizes = [1, 384], strides = [1, 1]} : vector<8x384xf32> to vector<1x384xf32>
    %cst_34 = arith.constant dense<0.000000e+00> : vector<1x384xf32>
    %214 = tpu.matmul %212, %18, %cst_34 {dimension_numbers = #tpu.dot_dimension_numbers<[1], [0], [0], [1], [0, 0, 1, 1], [], []>} : vector<1x128xf32>, vector<128x384xf32>, vector<1x384xf32> -> vector<1x384xf32>
    %215 = vector.extract_strided_slice %213 {offsets = [0, 0], sizes = [1, 128], strides = [1, 1]} : vector<1x384xf32> to vector<1x128xf32>
    %216 = vector.extract_strided_slice %214 {offsets = [0, 0], sizes = [1, 128], strides = [1, 1]} : vector<1x384xf32> to vector<1x128xf32>
    %217 = arith.addf %215, %216 : vector<1x128xf32>
    %218 = arith.negf %217 : vector<1x128xf32>
    %219 = math.exp %218 : vector<1x128xf32>
    %cst_35 = arith.constant 1.000000e+00 : f32
    %220 = vector.broadcast %cst_35 : f32 to vector<1x128xf32>
    %221 = arith.addf %220, %219 : vector<1x128xf32>
    %222 = arith.divf %220, %221 : vector<1x128xf32>
    %223 = vector.extract_strided_slice %213 {offsets = [0, 128], sizes = [1, 128], strides = [1, 1]} : vector<1x384xf32> to vector<1x128xf32>
    %224 = vector.extract_strided_slice %214 {offsets = [0, 128], sizes = [1, 128], strides = [1, 1]} : vector<1x384xf32> to vector<1x128xf32>
    %225 = arith.addf %223, %224 : vector<1x128xf32>
    %226 = arith.negf %225 : vector<1x128xf32>
    %227 = math.exp %226 : vector<1x128xf32>
    %cst_36 = arith.constant 1.000000e+00 : f32
    %228 = vector.broadcast %cst_36 : f32 to vector<1x128xf32>
    %229 = arith.addf %228, %227 : vector<1x128xf32>
    %230 = arith.divf %228, %229 : vector<1x128xf32>
    %231 = vector.extract_strided_slice %213 {offsets = [0, 256], sizes = [1, 128], strides = [1, 1]} : vector<1x384xf32> to vector<1x128xf32>
    %232 = vector.extract_strided_slice %214 {offsets = [0, 256], sizes = [1, 128], strides = [1, 1]} : vector<1x384xf32> to vector<1x128xf32>
    %233 = arith.addf %232, %3 : vector<1x128xf32>
    %234 = arith.mulf %222, %233 : vector<1x128xf32>
    %235 = arith.addf %231, %234 : vector<1x128xf32>
    %236 = math.tanh %235 : vector<1x128xf32>
    %cst_37 = arith.constant 1.000000e+00 : f32
    %237 = vector.broadcast %cst_37 : f32 to vector<1x128xf32>
    %238 = arith.subf %237, %230 : vector<1x128xf32>
    %239 = arith.mulf %238, %236 : vector<1x128xf32>
    %240 = arith.mulf %230, %212 : vector<1x128xf32>
    %241 = arith.addf %239, %240 : vector<1x128xf32>
    %c0_38 = arith.constant 0 : index
    %c0_39 = arith.constant 0 : index
    %242 = vector.load %arg4[%c0_38, %c0_39] : memref<3x128xf32, #tpu.memory_space<vmem>>, vector<1x128xf32>
    %243 = arith.mulf %241, %242 : vector<1x128xf32>
    %cst_40 = arith.constant dense<0.000000e+00> : vector<1xf32>
    %244 = vector.multi_reduction <add>, %243, %cst_40 [1] : vector<1x128xf32> to vector<1xf32>
    %245 = vector.shape_cast %244 : vector<1xf32> to vector<1x1xf32>
    %c2 = arith.constant 2 : index
    %c0_41 = arith.constant 0 : index
    %246 = vector.load %arg4[%c2, %c0_41] : memref<3x128xf32, #tpu.memory_space<vmem>>, vector<1x1xf32>
    %247 = arith.addf %245, %246 : vector<1x1xf32>
    %c1_42 = arith.constant 1 : index
    %c0_43 = arith.constant 0 : index
    %248 = vector.load %arg4[%c1_42, %c0_43] : memref<3x128xf32, #tpu.memory_space<vmem>>, vector<1x128xf32>
    %249 = arith.mulf %241, %248 : vector<1x128xf32>
    %cst_44 = arith.constant dense<0.000000e+00> : vector<1xf32>
    %250 = vector.multi_reduction <add>, %249, %cst_44 [1] : vector<1x128xf32> to vector<1xf32>
    %251 = vector.shape_cast %250 : vector<1xf32> to vector<1x1xf32>
    %c2_45 = arith.constant 2 : index
    %c1_46 = arith.constant 1 : index
    %252 = vector.load %arg4[%c2_45, %c1_46] : memref<3x128xf32, #tpu.memory_space<vmem>>, vector<1x1xf32>
    %253 = arith.addf %251, %252 : vector<1x1xf32>
    %254 = math.tanh %253 : vector<1x1xf32>
    %cst_47 = arith.constant -2.000000e+01 : f32
    %255 = vector.broadcast %cst_47 : f32 to vector<1x1xf32>
    %256 = arith.cmpf olt, %247, %255 : vector<1x1xf32>
    %257 = math.exp %247 : vector<1x1xf32>
    %cst_48 = arith.constant 0.000000e+00 : f32
    %258 = vector.broadcast %cst_48 : f32 to vector<1x1xf32>
    %259 = arith.select %256, %258, %257 : vector<1x1xi1>, vector<1x1xf32>
    %260 = arith.mulf %254, %259 : vector<1x1xf32>
    %c0_49 = arith.constant 0 : index
    %c0_50 = arith.constant 0 : index
    %261 = vector.load %arg5[%c0_49, %c0_50] : memref<1x1xf32, #tpu.memory_space<vmem>>, vector<1x1xf32>
    tpu.vector_store %arg5[%c0_49, %c0_50], %260 {strides = array<i32>} : memref<1x1xf32, #tpu.memory_space<vmem>>, vector<1x1xf32>,
    return
  }
}

</mosaic_0001>

<bundles_post_ra>
// kernel: tpu_custom_call.1
= control target key start
LH: loop header
LB: loop body
LE: loop exit
PB: predicated region body
PF: predicated region fallthrough
CT: control target
= control target key end

     0   :  { %10 = vsyncpa [#allocation3], 0  ;;  %s3064_s0 = inlined_call_operand.vmem [shape: f32[8,2], index: 0, kind: input, shape index: {}]   ;;  %s3065_s1 = inlined_call_operand.vmem [shape: f32[2,384], index: 1, kind: input, shape index: {}]   ;;  %s3066_s2 = inlined_call_operand.vmem [shape: f32[2,384], index: 2, kind: input, shape index: {}]   ;;  %s3067_s3 = inlined_call_operand.hbm [shape: bf16[128,384], index: 3, kind: input, shape index: {}]   ;;  %s3068_s4 = inlined_call_operand.vmem [shape: f32[3,128], index: 4, kind: input, shape index: {}]   ;;  %s3069_s5 = inlined_call_operand.hbm [shape: f32[1,1], index: 5, kind: output, shape index: {}]  }
   0x1   :  { %11 = vsyncpa [#allocation4], 0  ;;  %s2630_s18 = smov [#allocation2]   ;;  %s2582_s22 = scalar_lea.hbm %s3067_s3, 3072 }
   0x2   :  { %s23_s19 = sshll.u32 %s2630_s18, 4  ;;  %p2583_p0 = scmp.ne.s32.totalorder %s3067_s3, %s2582_s22  ;;  %s24_s19 = int_to_ptr.vmem [resolvable:$true] %s23_s19 }
   0x3   :  { %p2586_p1 = scmp.lt.u32.totalorder %s2582_s22, %s3067_s3 }
   0x5   :  { %p2588_p2 = pnand %p2586_p1, %p2583_p0 }
   0x7   :  { %2591 = shalt.err (!%p2588_p2)
}
   0x8   :  { %s2592_s27 = scalar_lea.vmem %s24_s19, 3072  ;;  %p2597_p4 = scmp.lt.s32.totalorder %s24_s19, %s24_s19 }
   0x9   :  { %p2593_p3 = scmp.ne.s32.totalorder %s24_s19, %s2592_s27  ;;  %p2598_p5 = scmp.lt.s32.totalorder %s2592_s27, %s2592_s27 }
   0xb   :  { %p2599_p6 = por %p2598_p5, %p2597_p4 }
   0xd   :  { %p2600_p7 = pnand %p2599_p6, %p2593_p3 }
   0xf   :  { %2603 = shalt.err (!%p2600_p7)
}
  0x10   :  { %s2631_s28 = smov 192   ;;  %s2632_s29 = smov 12  }
  0x11   :  { %29 = dma.hbm_to_vmem [thread:$0]  %s3067_s3, 3072, %s24_s19, [#allocation3], %s2631_s28, %s2631_s28, %s2632_s29  }
  0x12   :  { %2626 = dma.done.wait [#allocation3], 3072  }
  0x13   :  { %2627 = vsyncadd [#allocation3], 4294964224  ;;  %v2633_v0 = vmov 0   ;;  %v35_v1 = vld [vmem:[%s3064_s0] sm:$0xff]  ;;  %v2634_v2 = vmov 1   ;;  %v2635_v5 = vmov 0.0|0.0   ;;  %v45_v29 = vlaneseq }
  0x14   :  { %2464 = vset.pattern.permute.xlu0 %v2633_v0  ;;  %v2685_v3 = vld [vmem:[#allocation2 + $0x4] ss:$12 sps:$4 sm:$0xff]   ;;  %v2687_v4 = vld [vmem:[#allocation2] ss:$12 sps:$4 sm:$0xff]   ;;  %1926 = vmatprep.subr.bf16.mxu1 %v2635_v5  ;;  %v2690_v6 = vld [vmem:[#allocation2 + $0x8] ss:$12 sps:$4 sm:$0xff]  }
  0x15   :  { %41 = vperm.xlu0 %2464, %v35_v1   ;;  %v2692_v7 = vld [vmem:[#allocation2 + $0x1c] ss:$12 sps:$4 sm:$0xff]   ;;  %1895 = vmatprep.subr.bf16.mxu0 %v2685_v3  ;;  %v2697_v8 = vld [vmem:[#allocation2 + $0x18] ss:$12 sps:$4 sm:$0xff]   ;;  %v2699_v9 = vld [vmem:[#allocation2 + $0x20] ss:$12 sps:$4 sm:$0xff]  }
  0x16   :  { %1897 = vmatpush1.bf16.msra.mxu0 %v2687_v4  ;;  %1928 = vmatpush3.bf16.msra.mxu1 %v2690_v6  ;;  %v2703_v10 = vld [vmem:[#allocation2 + $0x34] ss:$12 sps:$4 sm:$0xff]   ;;  %v2705_v11 = vld [vmem:[#allocation2 + $0x30] ss:$12 sps:$4 sm:$0xff]   ;;  %v2709_v12 = vld [vmem:[#allocation2 + $0x38] ss:$12 sps:$4 sm:$0xff]  }
  0x17   :  { %1899 = vmatprep.subr.bf16.mxu0 %v2692_v7  ;;  %1929 = vmatprep.subr.bf16.mxu1 %v2635_v5  ;;  %v2713_v13 = vld [vmem:[#allocation2 + $0x4c] ss:$12 sps:$4 sm:$0xff]   ;;  %v2636_v14 = vmov 0.0   ;;  %v2718_v15 = vld [vmem:[#allocation2 + $0x48] ss:$12 sps:$4 sm:$0xff]   ;;  %vm2637_vm0 = vmmov 0  }
  0x18   :  { %292 = vmatprep.mubr.f32.mxu0 %v2636_v14  ;;  %v2720_v16 = vld [vmem:[#allocation2 + $0x50] ss:$12 sps:$4 sm:$0xff]   ;;  %1681 = vmatprep.mubr.msk.f32.mxu1 %vm2637_vm0, %v2636_v14  ;;  %v2730_v18 = vld [vmem:[#allocation2 + $0x60] ss:$12 sps:$4 sm:$0xff]   ;;  %v2732_v19 = vld [vmem:[#allocation2 + $0x68] ss:$12 sps:$4 sm:$0xff]  }
  0x19   :  { %2465 = vset.pattern.permute.xlu0 %v2634_v2  ;;  %v2724_v17 = vld [vmem:[#allocation2 + $0x64] ss:$12 sps:$4 sm:$0xff]   ;;  %v2736_v20 = vld [vmem:[#allocation2 + $0x7c] ss:$12 sps:$4 sm:$0xff]   ;;  %v2742_v22 = vld [vmem:[#allocation2 + $0x80] ss:$12 sps:$4 sm:$0xff]  }
  0x1a   :  { %76 = vperm.xlu0 %2465, %v35_v1   ;;  %1901 = vmatpush1.bf16.msra.mxu0 %v2697_v8  ;;  %v2740_v21 = vld [vmem:[#allocation2 + $0x78] ss:$12 sps:$4 sm:$0xff]   ;;  %v2746_v23 = vld [vmem:[#allocation2 + $0x94] ss:$12 sps:$4 sm:$0xff]   ;;  %v2750_v24 = vld [vmem:[#allocation2 + $0x90] ss:$12 sps:$4 sm:$0xff]  }
  0x1b   :  { %1931 = vmatpush3.bf16.msra.mxu1 %v2699_v9  ;;  %1903 = vmatprep.subr.bf16.mxu0 %v2703_v10  ;;  %v2752_v25 = vld [vmem:[#allocation2 + $0x98] ss:$12 sps:$4 sm:$0xff]   ;;  %v2760_v27 = vld [vmem:[#allocation2 + $0xa8] ss:$12 sps:$4 sm:$0xff]   ;;  %v2762_v28 = vld [vmem:[#allocation2 + $0xb0] ss:$12 sps:$4 sm:$0xff]  }
  0x1c   :  { %1932 = vmatprep.subr.bf16.mxu1 %v2635_v5  ;;  %v2756_v26 = vld [vmem:[#allocation2 + $0xac] ss:$12 sps:$4 sm:$0xff]   ;;  %v46_v30 = vshrl.u32 %v45_v29, 7  ;;  %vm1470_vm1 = vcmask 1047559   ;;  %s2638_s17 = smov 127   ;;  %s2639_s18 = smov [#allocation5]  }
  0x1d   :  { %v36_v34 = vld [vmem:[%s3065_s1] sm:$0x3f]  ;;  %s1505_s19 = sshll.u32 %s2639_s18, 4  ;;  %vm1497_vm3 = vcmask 7175   ;;  %s1506_s19 = int_to_ptr.vmem [resolvable:$true] %s1505_s19 }
  0x1e   :  { %1905 = vmatpush1.bf16.msra.mxu0 %v2705_v11  ;;  %v47_v31 = vsub.s32 0, %v46_v30  ;;  %v81_v32 = vsub.s32 1, %v46_v30  ;;  %v85_v33 = vsub.s32 3, %v46_v30  ;;  %v51_v35 = vsub.s32 2, %v46_v30  ;;  %s2608_s20 = scalar_lea.vmem %s1506_s19, 32  ;;  %p2609_p9 = scmp.lt.s32.totalorder %s1506_s19, %s1506_s19 }
  0x1f   :  { %1934 = vmatpush3.bf16.msra.mxu1 %v2709_v12  ;;  %1907 = vmatprep.subr.bf16.mxu0 %v2713_v13  ;;  %v37_v45 = vld [vmem:[%s3066_s2] ss:$2 sm:$0x7]  ;;  %v89_v59 = vsub.s32 5, %v46_v30  ;;  %v55_v60 = vsub.s32 4, %v46_v30 }
  0x20   :  { %1935 = vmatprep.subr.bf16.mxu1 %v2635_v5  ;;  %v48_v36 = vrot.slane %v36_v34, %v47_v31  ;;  %v82_v37 = vrot.slane %v36_v34, %v81_v32  ;;  %v86_v38 = vrot.slane %v36_v34, %v85_v33  ;;  %v52_v39 = vrot.slane %v36_v34, %v51_v35 }
  0x21   :  { %v116_v48 = vrot.slane %v37_v45, %v47_v31  ;;  %v120_v53 = vrot.slane %v37_v45, %v81_v32  ;;  %v90_v61 = vrot.slane %v36_v34, %v89_v59  ;;  %v56_v63 = vrot.slane %v36_v34, %v55_v60 }
  0x22   :  { %1909 = vmatpush1.bf16.msra.mxu0 %v2718_v15  ;;  %v63_v41 = vrot.slane %v48_v36, %v47_v31  ;;  %v97_v42 = vrot.slane %v82_v37, %v81_v32  ;;  %v101_v43 = vrot.slane %v86_v38, %v81_v32  ;;  %v67_v44 = vrot.slane %v52_v39, %v47_v31 }
  0x23   :  { %1937 = vmatpush3.bf16.msra.mxu1 %v2720_v16  ;;  %1911 = vmatprep.subr.bf16.mxu0 %v2724_v17  ;;  %v105_v1 = vrot.slane %v90_v61, %v81_v32  ;;  %v71_v2 = vrot.slane %v56_v63, %v47_v31  ;;  %v124_v37 = vrot.slane %v37_v45, %v51_v35 }
  0x24   :  { %1938 = vmatprep.subr.bf16.mxu1 %v2635_v5 }
  0x26   :  { %1913 = vmatpush1.bf16.msra.mxu0 %v2730_v18 }
  0x27   :  { %1940 = vmatpush3.bf16.msra.mxu1 %v2732_v19  ;;  %1915 = vmatprep.subr.bf16.mxu0 %v2736_v20 }
  0x28   :  { %1941 = vmatprep.subr.bf16.mxu1 %v2635_v5 }
  0x2a   :  { %1917 = vmatpush1.bf16.msra.mxu0 %v2740_v21 }
  0x2b   :  { %1943 = vmatpush3.bf16.msra.mxu1 %v2742_v22  ;;  %1919 = vmatprep.subr.bf16.mxu0 %v2746_v23 }
  0x2c   :  { %1944 = vmatprep.subr.bf16.mxu1 %v2635_v5 }
  0x2e   :  { %1921 = vmatpush1.bf16.msra.mxu0 %v2750_v24 }
  0x2f   :  { %1946 = vmatpush3.bf16.msra.mxu1 %v2752_v25  ;;  %1923 = vmatprep.subr.bf16.mxu0 %v2756_v26 }
  0x30   :  { %1947 = vmatprep.subr.bf16.mxu1 %v2635_v5 }
  0x32   :  { %1925 = vmatpush1.bf16.msra.mxu0 %v2760_v27 }
  0x33   :  { %1949 = vmatpush3.bf16.msra.mxu1 %v2762_v28  ;;  %1951 = vmatprep.subr.bf16.mxu0 %v2685_v3 }
  0x34   :  { %1982 = vmatprep.subr.bf16.mxu1 %v2635_v5 }
  0x94   :  { %v42_v40 = vpop.permute.xlu0 %41 }
  0x95   :  { %v72_v47 = vmul.f32 %v63_v41, %v42_v40  ;;  %v73_v51 = vmul.f32 %v67_v44, %v42_v40  ;;  %v74_v36 = vmul.f32 %v71_v2, %v42_v40  ;;  %v2785_v41 = vld [vmem:[%s3066_s2 + $0x1] sm:$0x1] }
  0x99   :  { %v77_v46 = vpop.permute.xlu0 %76 }
  0x9a   :  { %v106_v49 = vmul.f32 %v97_v42, %v77_v46  ;;  %v107_v50 = vmul.f32 %v101_v43, %v77_v46  ;;  %v108_v29 = vmul.f32 %v105_v1, %v77_v46 }
  0x9c   :  { %v109_v52 = vadd.f32 %v106_v49, %v72_v47  ;;  %v110_v54 = vadd.f32 %v107_v50, %v73_v51  ;;  %v111_v38 = vadd.f32 %v108_v29, %v74_v36 }
  0x9e   :  { %v2776_v55 = vadd.f32 %v116_v48, %v109_v52  ;;  %v2779_v57 = vadd.f32 %v120_v53, %v110_v54  ;;  %v2787_v42 = vadd.f32 %v124_v37, %v111_v38 }
  0xa0   :  { %v1514_v56 = vmul.f32 -1.442695, %v2776_v55  ;;  %v1515_v58 = vmul.f32 -1.442695, %v2779_v57 }
  0xa2   :  { %2498 = vpow2.f32 %v1514_v56 }
  0xa3   :  { %2500 = vpow2.f32 %v1515_v58 }
  0xac   :  { %v2499_v62 = vpop.eup %2498 }
  0xad   :  { %v214_v0 = vadd.f32 1.0, %v2499_v62  ;;  %v2501_v33 = vpop.eup %2500 }
  0xae   :  { %v220_v39 = vadd.f32 1.0, %v2501_v33 }
  0xaf   :  { %2502 = vrcp.f32 %v214_v0 }
  0xb0   :  { %2504 = vrcp.f32 %v220_v39 }
  0xb9   :  { %v2503_v30 = vpop.eup %2502 }
  0xba   :  { %v223_v34 = vmul.f32 %v2503_v30, %v2785_v41  ;;  %v2505_v31 = vpop.eup %2504 }
  0xbb   :  { %v226_v43 = vsub.f32 1.0, %v2505_v31 }
  0xbc   :  { %v224_v32 = vadd.f32 %v223_v34, %v2787_v42 }
  0xbe   :  { %2506 = vtanh.f32 %v224_v32 }
  0xc8   :  { %v2507_v40 = vpop.eup %2506 }
  0xc9   :  { %v227_v35 = vmul.f32 %v2507_v40, %v226_v43 }
  0xcb   :  { %293 = vmatmul.mubr.f32.vlgmr.msra.gmra.mrb[0].mxu0 %v227_v35  ;;  %1682 = vmatmul.mubr.f32.vlgmr.msra.gmra.mrb[0].mxu1 %v227_v35  ;;  %v399_v63 = vrot.slane %v227_v35, 7 }
  0xcc   :  { %1953 = vmatpush1.bf16.msra.mxu0 %v2687_v4  ;;  %1984 = vmatpush3.bf16.msra.mxu1 %v2690_v6 }
  0xcd   :  { %1955 = vmatprep.subr.bf16.mxu0 %v2692_v7  ;;  %1985 = vmatprep.subr.bf16.mxu1 %v2635_v5 }
  0xce   :  { %470 = vmatprep.mubr.f32.mxu0 %v2636_v14  ;;  %1716 = vmatprep.mubr.msk.f32.mxu1 %vm2637_vm0, %v2636_v14 }
  0xd0   :  { %1957 = vmatpush1.bf16.msra.mxu0 %v2697_v8  ;;  %1987 = vmatpush3.bf16.msra.mxu1 %v2699_v9 }
  0xd1   :  { %1959 = vmatprep.subr.bf16.mxu0 %v2703_v10  ;;  %1988 = vmatprep.subr.bf16.mxu1 %v2635_v5 }
  0xd4   :  { %1961 = vmatpush1.bf16.msra.mxu0 %v2705_v11  ;;  %1990 = vmatpush3.bf16.msra.mxu1 %v2709_v12 }
  0xd5   :  { %1963 = vmatprep.subr.bf16.mxu0 %v2713_v13  ;;  %1991 = vmatprep.subr.bf16.mxu1 %v2635_v5 }
  0xd8   :  { %1965 = vmatpush1.bf16.msra.mxu0 %v2718_v15  ;;  %1993 = vmatpush3.bf16.msra.mxu1 %v2720_v16 }
  0xd9   :  { %1967 = vmatprep.subr.bf16.mxu0 %v2724_v17  ;;  %1994 = vmatprep.subr.bf16.mxu1 %v2635_v5 }
  0xdc   :  { %1969 = vmatpush1.bf16.msra.mxu0 %v2730_v18  ;;  %1996 = vmatpush3.bf16.msra.mxu1 %v2732_v19 }
  0xdd   :  { %1971 = vmatprep.subr.bf16.mxu0 %v2736_v20  ;;  %1997 = vmatprep.subr.bf16.mxu1 %v2635_v5 }
  0xe0   :  { %1973 = vmatpush1.bf16.msra.mxu0 %v2740_v21  ;;  %1999 = vmatpush3.bf16.msra.mxu1 %v2742_v22 }
  0xe1   :  { %1975 = vmatprep.subr.bf16.mxu0 %v2746_v23  ;;  %2000 = vmatprep.subr.bf16.mxu1 %v2635_v5 }
  0xe4   :  { %1977 = vmatpush1.bf16.msra.mxu0 %v2750_v24  ;;  %2002 = vmatpush3.bf16.msra.mxu1 %v2752_v25 }
  0xe5   :  { %1979 = vmatprep.subr.bf16.mxu0 %v2756_v26  ;;  %2003 = vmatprep.subr.bf16.mxu1 %v2635_v5 }
  0xe8   :  { %1981 = vmatpush1.bf16.msra.mxu0 %v2760_v27  ;;  %2005 = vmatpush3.bf16.msra.mxu1 %v2762_v28 }
  0xe9   :  { %2007 = vmatprep.subr.bf16.mxu0 %v2685_v3  ;;  %2038 = vmatprep.subr.bf16.mxu1 %v2635_v5 }
 0x19e   :  { %v294_v44 = vpop.f32.mrb[0].mxu0  ;;  %v365_v45 = vpop.f32.mrb[0].mxu1 }
 0x19f   :  { %v370_v46 = vrot.slane %v294_v44, 7  ;;  %v296_v47 = vpop.f32.mrb[1].mxu0  ;;  %v1683_v48 = vpop.f32.mrb[1].mxu1  ;;  %v389_v60 = vadd.f32 %v365_v45, %v2785_v41 }
 0x1a0   :  { %v380_v49 = vrot.slane %v296_v47, 7 }
 0x1a1   :  { %v372_v50 = vadd.f32 %v370_v46, %v2776_v55  ;;  %v391_v61 = vrot.slane %v389_v60, 7 }
 0x1a2   :  { %v382_v51 = vadd.f32 %v380_v49, %v2779_v57 }
 0x1a3   :  { %v1516_v52 = vmul.f32 -1.442695, %v372_v50 }
 0x1a4   :  { %v1517_v53 = vmul.f32 -1.442695, %v382_v51 }
 0x1a5   :  { %2508 = vpow2.f32 %v1516_v52 }
 0x1a6   :  { %2510 = vpow2.f32 %v1517_v53 }
 0x1af   :  { %v2509_v54 = vpop.eup %2508 }
 0x1b0   :  { %v2511_v56 = vpop.eup %2510  ;;  %v376_v58 = vadd.f32 1.0, %v2509_v54 }
 0x1b1   :  { %v386_v59 = vadd.f32 1.0, %v2511_v56 }
 0x1b2   :  { %2512 = vrcp.f32 %v376_v58 }
 0x1b3   :  { %2514 = vrcp.f32 %v386_v59 }
 0x1bc   :  { %v2513_v62 = vpop.eup %2512 }
 0x1bd   :  { %v2515_v0 = vpop.eup %2514  ;;  %v393_v1 = vmul.f32 %v2513_v62, %v391_v61 }
 0x1be   :  { %v401_v2 = vmul.f32 %v2515_v0, %v399_v63  ;;  %v396_v33 = vsub.f32 1.0, %v2515_v0 }
 0x1bf   :  { %v394_v29 = vadd.f32 %v393_v1, %v2787_v42 }
 0x1c1   :  { %2516 = vtanh.f32 %v394_v29 }
 0x1cb   :  { %v2517_v36 = vpop.eup %2516 }
 0x1cc   :  { %v397_v37 = vmul.f32 %v2517_v36, %v396_v33 }
 0x1ce   :  { %v2830_v38 = vadd.f32 %v401_v2, %v397_v37 }
 0x1d0   :  { %v404_v39 = vrot.slane %v2830_v38, 1  ;;  %v576_v54 = vrot.slane %v2830_v38, 7 }
 0x1d2   :  { %471 = vmatmul.mubr.f32.vlgmr.msra.gmra.mrb[2].mxu0 %v404_v39  ;;  %1717 = vmatmul.mubr.f32.vlgmr.msra.gmra.mrb[2].mxu1 %v404_v39 }
 0x1d3   :  { %2009 = vmatpush1.bf16.msra.mxu0 %v2687_v4  ;;  %2040 = vmatpush3.bf16.msra.mxu1 %v2690_v6 }
 0x1d4   :  { %2011 = vmatprep.subr.bf16.mxu0 %v2692_v7  ;;  %2041 = vmatprep.subr.bf16.mxu1 %v2635_v5 }
 0x1d5   :  { %647 = vmatprep.mubr.f32.mxu0 %v2636_v14  ;;  %1751 = vmatprep.mubr.msk.f32.mxu1 %vm2637_vm0, %v2636_v14 }
 0x1d7   :  { %2013 = vmatpush1.bf16.msra.mxu0 %v2697_v8  ;;  %2043 = vmatpush3.bf16.msra.mxu1 %v2699_v9 }
 0x1d8   :  { %2015 = vmatprep.subr.bf16.mxu0 %v2703_v10  ;;  %2044 = vmatprep.subr.bf16.mxu1 %v2635_v5 }
 0x1db   :  { %2017 = vmatpush1.bf16.msra.mxu0 %v2705_v11  ;;  %2046 = vmatpush3.bf16.msra.mxu1 %v2709_v12 }
 0x1dc   :  { %2019 = vmatprep.subr.bf16.mxu0 %v2713_v13  ;;  %2047 = vmatprep.subr.bf16.mxu1 %v2635_v5 }
 0x1df   :  { %2021 = vmatpush1.bf16.msra.mxu0 %v2718_v15  ;;  %2049 = vmatpush3.bf16.msra.mxu1 %v2720_v16 }
 0x1e0   :  { %2023 = vmatprep.subr.bf16.mxu0 %v2724_v17  ;;  %2050 = vmatprep.subr.bf16.mxu1 %v2635_v5 }
 0x1e3   :  { %2025 = vmatpush1.bf16.msra.mxu0 %v2730_v18  ;;  %2052 = vmatpush3.bf16.msra.mxu1 %v2732_v19 }
 0x1e4   :  { %2027 = vmatprep.subr.bf16.mxu0 %v2736_v20  ;;  %2053 = vmatprep.subr.bf16.mxu1 %v2635_v5 }
 0x1e7   :  { %2029 = vmatpush1.bf16.msra.mxu0 %v2740_v21  ;;  %2055 = vmatpush3.bf16.msra.mxu1 %v2742_v22 }
 0x1e8   :  { %2031 = vmatprep.subr.bf16.mxu0 %v2746_v23  ;;  %2056 = vmatprep.subr.bf16.mxu1 %v2635_v5 }
 0x1eb   :  { %2033 = vmatpush1.bf16.msra.mxu0 %v2750_v24  ;;  %2058 = vmatpush3.bf16.msra.mxu1 %v2752_v25 }
 0x1ec   :  { %2035 = vmatprep.subr.bf16.mxu0 %v2756_v26  ;;  %2059 = vmatprep.subr.bf16.mxu1 %v2635_v5 }
 0x1ef   :  { %2037 = vmatpush1.bf16.msra.mxu0 %v2760_v27  ;;  %2061 = vmatpush3.bf16.msra.mxu1 %v2762_v28 }
 0x1f0   :  { %2063 = vmatprep.subr.bf16.mxu0 %v2685_v3  ;;  %2094 = vmatprep.subr.bf16.mxu1 %v2635_v5 }
 0x2a5   :  { %v472_v30 = vpop.f32.mrb[2].mxu0  ;;  %v543_v34 = vpop.f32.mrb[2].mxu1 }
 0x2a6   :  { %v548_v32 = vrot.slane %v472_v30, 6  ;;  %v474_v31 = vpop.f32.mrb[3].mxu0  ;;  %v1718_v43 = vpop.f32.mrb[3].mxu1  ;;  %v567_v51 = vadd.f32 %v543_v34, %v2785_v41 }
 0x2a7   :  { %v558_v40 = vrot.slane %v474_v31, 6 }
 0x2a8   :  { %v550_v35 = vadd.f32 %v548_v32, %v2776_v55  ;;  %v569_v52 = vrot.slane %v567_v51, 6 }
 0x2a9   :  { %v560_v44 = vadd.f32 %v558_v40, %v2779_v57 }
 0x2aa   :  { %v1518_v45 = vmul.f32 -1.442695, %v550_v35 }
 0x2ab   :  { %v1519_v46 = vmul.f32 -1.442695, %v560_v44 }
 0x2ac   :  { %2518 = vpow2.f32 %v1518_v45 }
 0x2ad   :  { %2520 = vpow2.f32 %v1519_v46 }
 0x2b6   :  { %v2519_v47 = vpop.eup %2518 }
 0x2b7   :  { %v2521_v48 = vpop.eup %2520  ;;  %v554_v49 = vadd.f32 1.0, %v2519_v47 }
 0x2b8   :  { %v564_v50 = vadd.f32 1.0, %v2521_v48 }
 0x2b9   :  { %2522 = vrcp.f32 %v554_v49 }
 0x2ba   :  { %2524 = vrcp.f32 %v564_v50 }
 0x2c3   :  { %v2523_v53 = vpop.eup %2522 }
 0x2c4   :  { %v2525_v56 = vpop.eup %2524  ;;  %v571_v58 = vmul.f32 %v2523_v53, %v569_v52 }
 0x2c5   :  { %v578_v59 = vmul.f32 %v2525_v56, %v576_v54  ;;  %v574_v61 = vsub.f32 1.0, %v2525_v56 }
 0x2c6   :  { %v572_v60 = vadd.f32 %v571_v58, %v2787_v42 }
 0x2c8   :  { %2526 = vtanh.f32 %v572_v60 }
 0x2d2   :  { %v2527_v62 = vpop.eup %2526 }
 0x2d3   :  { %v575_v63 = vmul.f32 %v2527_v62, %v574_v61 }
 0x2d5   :  { %v2873_v0 = vadd.f32 %v578_v59, %v575_v63 }
 0x2d7   :  { %v581_v1 = vrot.slane %v2873_v0, 2  ;;  %v753_v47 = vrot.slane %v2873_v0, 7 }
 0x2d9   :  { %648 = vmatmul.mubr.f32.vlgmr.msra.gmra.mrb[4].mxu0 %v581_v1  ;;  %1752 = vmatmul.mubr.f32.vlgmr.msra.gmra.mrb[4].mxu1 %v581_v1 }
 0x2da   :  { %2065 = vmatpush1.bf16.msra.mxu0 %v2687_v4  ;;  %2096 = vmatpush3.bf16.msra.mxu1 %v2690_v6 }
 0x2db   :  { %2067 = vmatprep.subr.bf16.mxu0 %v2692_v7  ;;  %2097 = vmatprep.subr.bf16.mxu1 %v2635_v5 }
 0x2dc   :  { %824 = vmatprep.mubr.f32.mxu0 %v2636_v14  ;;  %1786 = vmatprep.mubr.msk.f32.mxu1 %vm2637_vm0, %v2636_v14 }
 0x2de   :  { %2069 = vmatpush1.bf16.msra.mxu0 %v2697_v8  ;;  %2099 = vmatpush3.bf16.msra.mxu1 %v2699_v9 }
 0x2df   :  { %2071 = vmatprep.subr.bf16.mxu0 %v2703_v10  ;;  %2100 = vmatprep.subr.bf16.mxu1 %v2635_v5 }
 0x2e2   :  { %2073 = vmatpush1.bf16.msra.mxu0 %v2705_v11  ;;  %2102 = vmatpush3.bf16.msra.mxu1 %v2709_v12 }
 0x2e3   :  { %2075 = vmatprep.subr.bf16.mxu0 %v2713_v13  ;;  %2103 = vmatprep.subr.bf16.mxu1 %v2635_v5 }
 0x2e6   :  { %2077 = vmatpush1.bf16.msra.mxu0 %v2718_v15  ;;  %2105 = vmatpush3.bf16.msra.mxu1 %v2720_v16 }
 0x2e7   :  { %2079 = vmatprep.subr.bf16.mxu0 %v2724_v17  ;;  %2106 = vmatprep.subr.bf16.mxu1 %v2635_v5 }
 0x2ea   :  { %2081 = vmatpush1.bf16.msra.mxu0 %v2730_v18  ;;  %2108 = vmatpush3.bf16.msra.mxu1 %v2732_v19 }
 0x2eb   :  { %2083 = vmatprep.subr.bf16.mxu0 %v2736_v20  ;;  %2109 = vmatprep.subr.bf16.mxu1 %v2635_v5 }
 0x2ee   :  { %2085 = vmatpush1.bf16.msra.mxu0 %v2740_v21  ;;  %2111 = vmatpush3.bf16.msra.mxu1 %v2742_v22 }
 0x2ef   :  { %2087 = vmatprep.subr.bf16.mxu0 %v2746_v23  ;;  %2112 = vmatprep.subr.bf16.mxu1 %v2635_v5 }
 0x2f2   :  { %2089 = vmatpush1.bf16.msra.mxu0 %v2750_v24  ;;  %2114 = vmatpush3.bf16.msra.mxu1 %v2752_v25 }
 0x2f3   :  { %2091 = vmatprep.subr.bf16.mxu0 %v2756_v26  ;;  %2115 = vmatprep.subr.bf16.mxu1 %v2635_v5 }
 0x2f6   :  { %2093 = vmatpush1.bf16.msra.mxu0 %v2760_v27  ;;  %2117 = vmatpush3.bf16.msra.mxu1 %v2762_v28 }
 0x2f7   :  { %2119 = vmatprep.subr.bf16.mxu0 %v2685_v3  ;;  %2150 = vmatprep.subr.bf16.mxu1 %v2635_v5 }
 0x3ac   :  { %v649_v2 = vpop.f32.mrb[4].mxu0  ;;  %v720_v29 = vpop.f32.mrb[4].mxu1 }
 0x3ad   :  { %v725_v33 = vrot.slane %v649_v2, 5  ;;  %v651_v36 = vpop.f32.mrb[5].mxu0  ;;  %v1753_v37 = vpop.f32.mrb[5].mxu1  ;;  %v744_v44 = vadd.f32 %v720_v29, %v2785_v41 }
 0x3ae   :  { %v735_v38 = vrot.slane %v651_v36, 5 }
 0x3af   :  { %v727_v39 = vadd.f32 %v725_v33, %v2776_v55  ;;  %v746_v45 = vrot.slane %v744_v44, 5 }
 0x3b0   :  { %v737_v30 = vadd.f32 %v735_v38, %v2779_v57 }
 0x3b1   :  { %v1520_v34 = vmul.f32 -1.442695, %v727_v39 }
 0x3b2   :  { %v1521_v32 = vmul.f32 -1.442695, %v737_v30 }
 0x3b3   :  { %2528 = vpow2.f32 %v1520_v34 }
 0x3b4   :  { %2530 = vpow2.f32 %v1521_v32 }
 0x3bd   :  { %v2529_v31 = vpop.eup %2528 }
 0x3be   :  { %v2531_v43 = vpop.eup %2530  ;;  %v731_v40 = vadd.f32 1.0, %v2529_v31 }
 0x3bf   :  { %v741_v35 = vadd.f32 1.0, %v2531_v43 }
 0x3c0   :  { %2532 = vrcp.f32 %v731_v40 }
 0x3c1   :  { %2534 = vrcp.f32 %v741_v35 }
 0x3ca   :  { %v2533_v46 = vpop.eup %2532 }
 0x3cb   :  { %v2535_v48 = vpop.eup %2534  ;;  %v748_v49 = vmul.f32 %v2533_v46, %v746_v45 }
 0x3cc   :  { %v755_v50 = vmul.f32 %v2535_v48, %v753_v47  ;;  %v751_v52 = vsub.f32 1.0, %v2535_v48 }
 0x3cd   :  { %v749_v51 = vadd.f32 %v748_v49, %v2787_v42 }
 0x3cf   :  { %2536 = vtanh.f32 %v749_v51 }
 0x3d9   :  { %v2537_v53 = vpop.eup %2536 }
 0x3da   :  { %v752_v54 = vmul.f32 %v2537_v53, %v751_v52 }
 0x3dc   :  { %v2916_v56 = vadd.f32 %v755_v50, %v752_v54 }
 0x3de   :  { %v758_v58 = vrot.slane %v2916_v56, 3  ;;  %v930_v31 = vrot.slane %v2916_v56, 7 }
 0x3e0   :  { %825 = vmatmul.mubr.f32.vlgmr.msra.gmra.mrb[6].mxu0 %v758_v58  ;;  %1787 = vmatmul.mubr.f32.vlgmr.msra.gmra.mrb[6].mxu1 %v758_v58 }
 0x3e1   :  { %2121 = vmatpush1.bf16.msra.mxu0 %v2687_v4  ;;  %2152 = vmatpush3.bf16.msra.mxu1 %v2690_v6 }
 0x3e2   :  { %2123 = vmatprep.subr.bf16.mxu0 %v2692_v7  ;;  %2153 = vmatprep.subr.bf16.mxu1 %v2635_v5 }
 0x3e3   :  { %1001 = vmatprep.mubr.f32.mxu0 %v2636_v14  ;;  %1821 = vmatprep.mubr.msk.f32.mxu1 %vm2637_vm0, %v2636_v14 }
 0x3e5   :  { %2125 = vmatpush1.bf16.msra.mxu0 %v2697_v8  ;;  %2155 = vmatpush3.bf16.msra.mxu1 %v2699_v9 }
 0x3e6   :  { %2127 = vmatprep.subr.bf16.mxu0 %v2703_v10  ;;  %2156 = vmatprep.subr.bf16.mxu1 %v2635_v5 }
 0x3e9   :  { %2129 = vmatpush1.bf16.msra.mxu0 %v2705_v11  ;;  %2158 = vmatpush3.bf16.msra.mxu1 %v2709_v12 }
 0x3ea   :  { %2131 = vmatprep.subr.bf16.mxu0 %v2713_v13  ;;  %2159 = vmatprep.subr.bf16.mxu1 %v2635_v5 }
 0x3ed   :  { %2133 = vmatpush1.bf16.msra.mxu0 %v2718_v15  ;;  %2161 = vmatpush3.bf16.msra.mxu1 %v2720_v16 }
 0x3ee   :  { %2135 = vmatprep.subr.bf16.mxu0 %v2724_v17  ;;  %2162 = vmatprep.subr.bf16.mxu1 %v2635_v5 }
 0x3f1   :  { %2137 = vmatpush1.bf16.msra.mxu0 %v2730_v18  ;;  %2164 = vmatpush3.bf16.msra.mxu1 %v2732_v19 }
 0x3f2   :  { %2139 = vmatprep.subr.bf16.mxu0 %v2736_v20  ;;  %2165 = vmatprep.subr.bf16.mxu1 %v2635_v5 }
 0x3f5   :  { %2141 = vmatpush1.bf16.msra.mxu0 %v2740_v21  ;;  %2167 = vmatpush3.bf16.msra.mxu1 %v2742_v22 }
 0x3f6   :  { %2143 = vmatprep.subr.bf16.mxu0 %v2746_v23  ;;  %2168 = vmatprep.subr.bf16.mxu1 %v2635_v5 }
 0x3f9   :  { %2145 = vmatpush1.bf16.msra.mxu0 %v2750_v24  ;;  %2170 = vmatpush3.bf16.msra.mxu1 %v2752_v25 }
 0x3fa   :  { %2147 = vmatprep.subr.bf16.mxu0 %v2756_v26  ;;  %2171 = vmatprep.subr.bf16.mxu1 %v2635_v5 }
 0x3fd   :  { %2149 = vmatpush1.bf16.msra.mxu0 %v2760_v27  ;;  %2173 = vmatpush3.bf16.msra.mxu1 %v2762_v28 }
 0x3fe   :  { %2175 = vmatprep.subr.bf16.mxu0 %v2685_v3  ;;  %2206 = vmatprep.subr.bf16.mxu1 %v2635_v5 }
 0x4b3   :  { %v826_v59 = vpop.f32.mrb[6].mxu0  ;;  %v897_v60 = vpop.f32.mrb[6].mxu1 }
 0x4b4   :  { %v902_v61 = vrot.slane %v826_v59, 4  ;;  %v828_v62 = vpop.f32.mrb[7].mxu0  ;;  %v1788_v63 = vpop.f32.mrb[7].mxu1  ;;  %v921_v30 = vadd.f32 %v897_v60, %v2785_v41 }
 0x4b5   :  { %v912_v0 = vrot.slane %v828_v62, 4 }
 0x4b6   :  { %v904_v1 = vadd.f32 %v902_v61, %v2776_v55  ;;  %v923_v34 = vrot.slane %v921_v30, 4 }
 0x4b7   :  { %v914_v2 = vadd.f32 %v912_v0, %v2779_v57 }
 0x4b8   :  { %v1522_v29 = vmul.f32 -1.442695, %v904_v1 }
 0x4b9   :  { %v1523_v33 = vmul.f32 -1.442695, %v914_v2 }
 0x4ba   :  { %2538 = vpow2.f32 %v1522_v29 }
 0x4bb   :  { %2540 = vpow2.f32 %v1523_v33 }
 0x4c4   :  { %v2539_v36 = vpop.eup %2538 }
 0x4c5   :  { %v2541_v37 = vpop.eup %2540  ;;  %v908_v38 = vadd.f32 1.0, %v2539_v36 }
 0x4c6   :  { %v918_v39 = vadd.f32 1.0, %v2541_v37 }
 0x4c7   :  { %2542 = vrcp.f32 %v908_v38 }
 0x4c8   :  { %2544 = vrcp.f32 %v918_v39 }
 0x4d1   :  { %v2543_v32 = vpop.eup %2542 }
 0x4d2   :  { %v2545_v43 = vpop.eup %2544  ;;  %v925_v40 = vmul.f32 %v2543_v32, %v923_v34 }
 0x4d3   :  { %v932_v35 = vmul.f32 %v2545_v43, %v930_v31  ;;  %v928_v45 = vsub.f32 1.0, %v2545_v43 }
 0x4d4   :  { %v926_v44 = vadd.f32 %v925_v40, %v2787_v42 }
 0x4d6   :  { %2546 = vtanh.f32 %v926_v44 }
 0x4e0   :  { %v2547_v46 = vpop.eup %2546 }
 0x4e1   :  { %v929_v47 = vmul.f32 %v2547_v46, %v928_v45 }
 0x4e3   :  { %v2959_v48 = vadd.f32 %v932_v35, %v929_v47 }
 0x4e5   :  { %v935_v49 = vrot.slane %v2959_v48, 4  ;;  %v1107_v33 = vrot.slane %v2959_v48, 7 }
 0x4e7   :  { %1002 = vmatmul.mubr.f32.vlgmr.msra.gmra.mrb[8].mxu0 %v935_v49  ;;  %1822 = vmatmul.mubr.f32.vlgmr.msra.gmra.mrb[8].mxu1 %v935_v49 }
 0x4e8   :  { %2177 = vmatpush1.bf16.msra.mxu0 %v2687_v4  ;;  %2208 = vmatpush3.bf16.msra.mxu1 %v2690_v6 }
 0x4e9   :  { %2179 = vmatprep.subr.bf16.mxu0 %v2692_v7  ;;  %2209 = vmatprep.subr.bf16.mxu1 %v2635_v5 }
 0x4ea   :  { %1178 = vmatprep.mubr.f32.mxu0 %v2636_v14  ;;  %1856 = vmatprep.mubr.msk.f32.mxu1 %vm2637_vm0, %v2636_v14 }
 0x4ec   :  { %2181 = vmatpush1.bf16.msra.mxu0 %v2697_v8  ;;  %2211 = vmatpush3.bf16.msra.mxu1 %v2699_v9 }
 0x4ed   :  { %2183 = vmatprep.subr.bf16.mxu0 %v2703_v10  ;;  %2212 = vmatprep.subr.bf16.mxu1 %v2635_v5 }
 0x4f0   :  { %2185 = vmatpush1.bf16.msra.mxu0 %v2705_v11  ;;  %2214 = vmatpush3.bf16.msra.mxu1 %v2709_v12 }
 0x4f1   :  { %2187 = vmatprep.subr.bf16.mxu0 %v2713_v13  ;;  %2215 = vmatprep.subr.bf16.mxu1 %v2635_v5 }
 0x4f4   :  { %2189 = vmatpush1.bf16.msra.mxu0 %v2718_v15  ;;  %2217 = vmatpush3.bf16.msra.mxu1 %v2720_v16 }
 0x4f5   :  { %2191 = vmatprep.subr.bf16.mxu0 %v2724_v17  ;;  %2218 = vmatprep.subr.bf16.mxu1 %v2635_v5 }
 0x4f8   :  { %2193 = vmatpush1.bf16.msra.mxu0 %v2730_v18  ;;  %2220 = vmatpush3.bf16.msra.mxu1 %v2732_v19 }
 0x4f9   :  { %2195 = vmatprep.subr.bf16.mxu0 %v2736_v20  ;;  %2221 = vmatprep.subr.bf16.mxu1 %v2635_v5 }
 0x4fc   :  { %2197 = vmatpush1.bf16.msra.mxu0 %v2740_v21  ;;  %2223 = vmatpush3.bf16.msra.mxu1 %v2742_v22 }
 0x4fd   :  { %2199 = vmatprep.subr.bf16.mxu0 %v2746_v23  ;;  %2224 = vmatprep.subr.bf16.mxu1 %v2635_v5 }
 0x500   :  { %2201 = vmatpush1.bf16.msra.mxu0 %v2750_v24  ;;  %2226 = vmatpush3.bf16.msra.mxu1 %v2752_v25 }
 0x501   :  { %2203 = vmatprep.subr.bf16.mxu0 %v2756_v26  ;;  %2227 = vmatprep.subr.bf16.mxu1 %v2635_v5 }
 0x504   :  { %2205 = vmatpush1.bf16.msra.mxu0 %v2760_v27  ;;  %2229 = vmatpush3.bf16.msra.mxu1 %v2762_v28 }
 0x505   :  { %2231 = vmatprep.subr.bf16.mxu0 %v2685_v3  ;;  %2262 = vmatprep.subr.bf16.mxu1 %v2635_v5 }
 0x5ba   :  { %v1003_v50 = vpop.f32.mrb[8].mxu0  ;;  %v1074_v51 = vpop.f32.mrb[8].mxu1 }
 0x5bb   :  { %v1079_v52 = vrot.slane %v1003_v50, 3  ;;  %v1005_v53 = vpop.f32.mrb[9].mxu0  ;;  %v1823_v54 = vpop.f32.mrb[9].mxu1  ;;  %v1098_v1 = vadd.f32 %v1074_v51, %v2785_v41 }
 0x5bc   :  { %v1089_v56 = vrot.slane %v1005_v53, 3 }
 0x5bd   :  { %v1081_v58 = vadd.f32 %v1079_v52, %v2776_v55  ;;  %v1100_v2 = vrot.slane %v1098_v1, 3  ;;  %v1465_v1 = vld [vmem:[%s3068_s4] sm:$0x1] }
 0x5be   :  { %v1091_v59 = vadd.f32 %v1089_v56, %v2779_v57 }
 0x5bf   :  { %v1524_v60 = vmul.f32 -1.442695, %v1081_v58 }
 0x5c0   :  { %v1525_v61 = vmul.f32 -1.442695, %v1091_v59 }
 0x5c1   :  { %2548 = vpow2.f32 %v1524_v60 }
 0x5c2   :  { %2550 = vpow2.f32 %v1525_v61 }
 0x5cb   :  { %v2549_v62 = vpop.eup %2548 }
 0x5cc   :  { %v2551_v63 = vpop.eup %2550  ;;  %v1085_v0 = vadd.f32 1.0, %v2549_v62 }
 0x5cd   :  { %v1095_v3 = vadd.f32 1.0, %v2551_v63 }
 0x5ce   :  { %2552 = vrcp.f32 %v1085_v0 }
 0x5cf   :  { %2554 = vrcp.f32 %v1095_v3 }
 0x5d8   :  { %v2553_v29 = vpop.eup %2552 }
 0x5d9   :  { %v2555_v36 = vpop.eup %2554  ;;  %v1102_v37 = vmul.f32 %v2553_v29, %v1100_v2 }
 0x5da   :  { %v1109_v38 = vmul.f32 %v2555_v36, %v1107_v33  ;;  %v1105_v30 = vsub.f32 1.0, %v2555_v36  ;;  %v1479_v33 = vld [vmem:[%s3068_s4 + $0x1] sm:$0x1]  ;;  %v1467_v36 = vrot.slane %v1465_v1, 1 }
 0x5db   :  { %v1103_v39 = vadd.f32 %v1102_v37, %v2787_v42 }
 0x5dd   :  { %2556 = vtanh.f32 %v1103_v39 }
 0x5e7   :  { %v2557_v34 = vpop.eup %2556 }
 0x5e8   :  { %v1106_v32 = vmul.f32 %v2557_v34, %v1105_v30 }
 0x5ea   :  { %v1110_v31 = vadd.f32 %v1109_v38, %v1106_v32  ;;  %v1481_v38 = vrot.slane %v1479_v33, 1  ;;  %v1474_v32 = vld [vmem:[%s3068_s4 + $0x2] sm:$0x1]  ;;  %s2604_s4 = scalar_lea.vmem %s1506_s19, 16 }
 0x5eb   :  { %p2605_p8 = scmp.ne.s32.totalorder %s1506_s19, %s2604_s4  ;;  %p2610_p10 = scmp.lt.s32.totalorder %s2608_s20, %s2604_s4 }
 0x5ec   :  { %v1112_v43 = vrot.slane %v1110_v31, 5 }
 0x5ed   :  { %p2611_p11 = por %p2610_p10, %p2609_p9 }
 0x5ee   :  { %1179 = vmatmul.mubr.f32.vlgmr.msra.gmra.mrb[10].mxu0 %v1112_v43  ;;  %1857 = vmatmul.mubr.f32.vlgmr.msra.gmra.mrb[10].mxu1 %v1112_v43 }
 0x5ef   :  { %2233 = vmatpush1.bf16.msra.mxu0 %v2687_v4  ;;  %2264 = vmatpush3.bf16.msra.mxu1 %v2690_v6  ;;  %p2612_p12 = pnand %p2611_p11, %p2605_p8 }
 0x5f0   :  { %2235 = vmatprep.subr.bf16.mxu0 %v2692_v7  ;;  %2265 = vmatprep.subr.bf16.mxu1 %v2635_v5 }
 0x5f1   :  { %1355 = vmatprep.mubr.f32.mxu0 %v2636_v14  ;;  %1891 = vmatprep.mubr.msk.f32.mxu1 %vm2637_vm0, %v2636_v14 }
 0x5f3   :  { %2237 = vmatpush1.bf16.msra.mxu0 %v2697_v8  ;;  %2267 = vmatpush3.bf16.msra.mxu1 %v2699_v9 }
 0x5f4   :  { %2239 = vmatprep.subr.bf16.mxu0 %v2703_v10  ;;  %2268 = vmatprep.subr.bf16.mxu1 %v2635_v5 }
 0x5f7   :  { %2241 = vmatpush1.bf16.msra.mxu0 %v2705_v11  ;;  %2270 = vmatpush3.bf16.msra.mxu1 %v2709_v12 }
 0x5f8   :  { %2243 = vmatprep.subr.bf16.mxu0 %v2713_v13  ;;  %2271 = vmatprep.subr.bf16.mxu1 %v2635_v5 }
 0x5fb   :  { %2245 = vmatpush1.bf16.msra.mxu0 %v2718_v15  ;;  %2273 = vmatpush3.bf16.msra.mxu1 %v2720_v16 }
 0x5fc   :  { %2247 = vmatprep.subr.bf16.mxu0 %v2724_v17  ;;  %2274 = vmatprep.subr.bf16.mxu1 %v2635_v5 }
 0x5ff   :  { %2249 = vmatpush1.bf16.msra.mxu0 %v2730_v18  ;;  %2276 = vmatpush3.bf16.msra.mxu1 %v2732_v19 }
 0x600   :  { %2251 = vmatprep.subr.bf16.mxu0 %v2736_v20  ;;  %2277 = vmatprep.subr.bf16.mxu1 %v2635_v5 }
 0x603   :  { %2253 = vmatpush1.bf16.msra.mxu0 %v2740_v21  ;;  %2279 = vmatpush3.bf16.msra.mxu1 %v2742_v22  ;;  %v1284_v21 = vrot.slane %v1110_v31, 7  ;;  %v1476_v31 = vrot.slane %v1474_v32, 1 }
 0x604   :  { %2255 = vmatprep.subr.bf16.mxu0 %v2746_v23  ;;  %2280 = vmatprep.subr.bf16.mxu1 %v2635_v5 }
 0x607   :  { %2257 = vmatpush1.bf16.msra.mxu0 %v2750_v24  ;;  %2282 = vmatpush3.bf16.msra.mxu1 %v2752_v25 }
 0x608   :  { %2259 = vmatprep.subr.bf16.mxu0 %v2756_v26  ;;  %2283 = vmatprep.subr.bf16.mxu1 %v2635_v5 }
 0x60b   :  { %2261 = vmatpush1.bf16.msra.mxu0 %v2760_v27  ;;  %2285 = vmatpush3.bf16.msra.mxu1 %v2762_v28 }
 0x6c1   :  { %v1180_v4 = vpop.f32.mrb[10].mxu0  ;;  %v1251_v6 = vpop.f32.mrb[10].mxu1 }
 0x6c2   :  { %v1256_v7 = vrot.slane %v1180_v4, 2  ;;  %v1182_v8 = vpop.f32.mrb[11].mxu0  ;;  %v1858_v9 = vpop.f32.mrb[11].mxu1  ;;  %v1275_v18 = vadd.f32 %v1251_v6, %v2785_v41 }
 0x6c3   :  { %v1266_v10 = vrot.slane %v1182_v8, 2 }
 0x6c4   :  { %v1258_v11 = vadd.f32 %v1256_v7, %v2776_v55  ;;  %v1277_v19 = vrot.slane %v1275_v18, 2 }
 0x6c5   :  { %v1268_v12 = vadd.f32 %v1266_v10, %v2779_v57 }
 0x6c6   :  { %v1526_v13 = vmul.f32 -1.442695, %v1258_v11 }
 0x6c7   :  { %v1527_v14 = vmul.f32 -1.442695, %v1268_v12 }
 0x6c8   :  { %2558 = vpow2.f32 %v1526_v13 }
 0x6c9   :  { %2560 = vpow2.f32 %v1527_v14 }
 0x6d2   :  { %v2559_v15 = vpop.eup %2558 }
 0x6d3   :  { %v2561_v5 = vpop.eup %2560  ;;  %v1262_v16 = vadd.f32 1.0, %v2559_v15 }
 0x6d4   :  { %v1272_v17 = vadd.f32 1.0, %v2561_v5 }
 0x6d5   :  { %2562 = vrcp.f32 %v1262_v16 }
 0x6d6   :  { %2564 = vrcp.f32 %v1272_v17 }
 0x6df   :  { %v2563_v20 = vpop.eup %2562 }
 0x6e0   :  { %v2565_v22 = vpop.eup %2564  ;;  %v1279_v23 = vmul.f32 %v2563_v20, %v1277_v19 }
 0x6e1   :  { %v1286_v24 = vmul.f32 %v2565_v22, %v1284_v21  ;;  %v1282_v26 = vsub.f32 1.0, %v2565_v22 }
 0x6e2   :  { %v1280_v25 = vadd.f32 %v1279_v23, %v2787_v42 }
 0x6e4   :  { %2566 = vtanh.f32 %v1280_v25 }
 0x6ee   :  { %v2567_v27 = vpop.eup %2566 }
 0x6ef   :  { %v1283_v28 = vmul.f32 %v2567_v27, %v1282_v26 }
 0x6f1   :  { %v1287_v40 = vadd.f32 %v1286_v24, %v1283_v28 }
 0x6f3   :  { %v1289_v35 = vrot.slane %v1287_v40, 6  ;;  %v1461_v63 = vrot.slane %v1287_v40, 7 }
 0x6f5   :  { %1356 = vmatmul.mubr.f32.vlgmr.msra.gmra.mrb[12].mxu0 %v1289_v35  ;;  %1892 = vmatmul.mubr.f32.vlgmr.msra.gmra.mrb[12].mxu1 %v1289_v35 }
 0x7c8   :  { %v1357_v44 = vpop.f32.mrb[12].mxu0  ;;  %v1428_v45 = vpop.f32.mrb[12].mxu1 }
 0x7c9   :  { %v1433_v46 = vrot.slane %v1357_v44, 1  ;;  %v1359_v47 = vpop.f32.mrb[13].mxu0  ;;  %v1893_v48 = vpop.f32.mrb[13].mxu1  ;;  %v1452_v60 = vadd.f32 %v1428_v45, %v2785_v41 }
 0x7ca   :  { %v1443_v49 = vrot.slane %v1359_v47, 1 }
 0x7cb   :  { %v1435_v50 = vadd.f32 %v1433_v46, %v2776_v55  ;;  %v1454_v61 = vrot.slane %v1452_v60, 1 }
 0x7cc   :  { %v1445_v51 = vadd.f32 %v1443_v49, %v2779_v57 }
 0x7cd   :  { %v1528_v52 = vmul.f32 -1.442695, %v1435_v50 }
 0x7ce   :  { %v1529_v53 = vmul.f32 -1.442695, %v1445_v51 }
 0x7cf   :  { %2568 = vpow2.f32 %v1528_v52 }
 0x7d0   :  { %2570 = vpow2.f32 %v1529_v53 }
 0x7d9   :  { %v2569_v54 = vpop.eup %2568 }
 0x7da   :  { %v2571_v56 = vpop.eup %2570  ;;  %v1439_v58 = vadd.f32 1.0, %v2569_v54 }
 0x7db   :  { %v1449_v59 = vadd.f32 1.0, %v2571_v56 }
 0x7dc   :  { %2572 = vrcp.f32 %v1439_v58 }
 0x7dd   :  { %2574 = vrcp.f32 %v1449_v59 }
 0x7e6   :  { %v2573_v62 = vpop.eup %2572 }
 0x7e7   :  { %v2575_v0 = vpop.eup %2574  ;;  %v1456_v3 = vmul.f32 %v2573_v62, %v1454_v61 }
 0x7e8   :  { %v1463_v55 = vmul.f32 %v2575_v0, %v1461_v63  ;;  %v1459_v2 = vsub.f32 1.0, %v2575_v0 }
 0x7e9   :  { %v1457_v57 = vadd.f32 %v1456_v3, %v2787_v42 }
 0x7eb   :  { %2576 = vtanh.f32 %v1457_v57 }
 0x7f5   :  { %v2577_v29 = vpop.eup %2576 }
 0x7f6   :  { %v1460_v41 = vmul.f32 %v2577_v29, %v1459_v2 }
 0x7f8   :  { %v1464_v37 = vadd.f32 %v1463_v55, %v1460_v41 }
 0x7fa   :  { %v1469_v39 = vmul.f32 %v1467_v36, %v1464_v37  ;;  %v1483_v34 = vmul.f32 %v1481_v38, %v1464_v37 }
 0x7fc   :  { %v1471_v30 = vsel %vm1470_vm1, %v1469_v39, 0.0  ;;  %v1484_v42 = vsel %vm1470_vm1, %v1483_v34, 0.0 }
 0x7fd   :  { %1472 = vadd.xlane.f32.xlu1 %v1471_v30 }
 0x801   :  { %1485 = vadd.xlane.f32.xlu1 %v1484_v42 }
 0x812   :  { %1487 = vrot.lane.b32.xlu1 %v1476_v31, %s2638_s17 }
 0x88a   :  { %v1473_v43 = vpop.xlane.xlu1 %1472 }
 0x88b   :  { %v1478_v4 = vadd.f32 %v1476_v31, %v1473_v43 }
 0x88d   :  { %v1493_v6 = vmul.f32 1.442695, %v1478_v4  ;;  %vm1492_vm2 = vcmp.lt.f32.partialorder %v1478_v4, -20.0 }
 0x88e   :  { %v1486_v7 = vpop.xlane.xlu1 %1485 }
 0x88f   :  { %2578 = vpow2.f32 %v1493_v6 }
 0x892   :  { %v1488_v8 = vpop.permute.xlu1 %1487 }
 0x893   :  { %v1490_v9 = vadd.f32 %v1488_v8, %v1486_v7 }
 0x895   :  { %2580 = vtanh.f32 %v1490_v9 }
 0x899   :  { %v2579_v10 = vpop.eup %2578 }
 0x89a   :  { %v1495_v12 = vsel %vm1492_vm2, 0.0, %v2579_v10 }
 0x89f   :  { %v2581_v11 = vpop.eup %2580 }
 0x8a0   :  { %v1496_v13 = vmul.f32 %v2581_v11, %v1495_v12 }
 0x8a2   :  { %1498 = vst.msk [vmem:[#allocation5 - $0x7] sm:$0x80] %vm1497_vm3, %v1496_v13 }
 0x8a3   :  { %2615 = shalt.err (!%p2612_p12)
}
 0x8a4   :  { %s2616_s23 = scalar_lea.hbm %s3069_s5, 16 }
 0x8a5   :  { %p2617_p13 = scmp.ne.s32.totalorder %s3069_s5, %s2616_s23  ;;  %p2620_p0 = scmp.lt.u32.totalorder %s2616_s23, %s3069_s5 }
 0x8a7   :  { %p2622_p1 = pnand %p2620_p0, %p2617_p13 }
 0x8a9   :  { %2625 = shalt.err (!%p2622_p1)
}
 0x8aa   :  { %1508 = dma.vmem_to_hbm [thread:$0]  %s1506_s19, 16, %s3069_s5, [#allocation4]  }
 0x8ab   :  { %2628 = dma.done.wait [#allocation4], 16  }
 0x8ac   :  { %2629 = vsyncadd [#allocation4], 4294967280 }
 0x8ad   :  { %1512 = vsyncpa [#allocation3], 1 }
 0x8ae   :  { %1513 = vsyncpa [#allocation4], 1 }

</bundles_post_ra>
